<compile_context>
chip_gen: v7x
topology: tpu7x:2x2x1
jax: 0.10.0
libtpu: 0.0.40
codegen_flags: <defaults>
</compile_context>

<pallas_src>
import functools

import jax
import jax.numpy as jnp
from jax import lax
from jax.experimental import pallas as pl
from jax.experimental.pallas import tpu as pltpu


def encoder_layer_kernel(x_ref, mask_ref,
                         w_qkv_ref, b_qkv_ref, w_out_ref, vec_ref,
                         w1_ref, b1_ref, w2_ref,
                         o_ref, *, n_head):
    bt, S, D = x_ref.shape
    dt = D // n_head
    rows = bt * S
    eps = 1e-12

    x = x_ref[...]                          # (bt, S, D)
    x2 = x.reshape(rows, D)                 # (rows, D)

    # ---- fused QKV projection, head-batched (no weight replication over batch) ----
    xh = jnp.broadcast_to(x2[None], (n_head, rows, D))                      # (nh, rows, D)
    qkv = jnp.einsum('hrd,hde->hre', xh, w_qkv_ref[...],
                     preferred_element_type=jnp.float32) + b_qkv_ref[...]   # (nh, rows, 3*dt)
    qkv = qkv.reshape(n_head * bt, S, 3 * dt)                               # head-major (h*bt + b)
    q = qkv[..., 0 * dt:1 * dt]             # 1/sqrt(dt) already folded into wq/bq
    k = qkv[..., 1 * dt:2 * dt]
    v = qkv[..., 2 * dt:3 * dt]

    # ---- attention: batched contraction over (n_head * batch_tile), mask applied once ----
    mask = mask_ref[...]                                                     # (bt, 1, S)
    mask_h = jnp.broadcast_to(mask[None], (n_head, bt, 1, S)).reshape(n_head * bt, 1, S)
    s = jnp.einsum('bqd,bkd->bqk', q, k,
                   preferred_element_type=jnp.float32)                       # (nh*bt, S, S)
    s = jnp.where(mask_h == 0.0, -10000.0, s)                                # masked_fill(mask==0, -1e4)
    s = s - jnp.max(s, axis=-1, keepdims=True)
    p = jnp.exp(s)
    p = p * pl.reciprocal(jnp.sum(p, axis=-1, keepdims=True), approx=True)
    ctx = jnp.einsum('bqk,bkd->bqd', p, v,
                     preferred_element_type=jnp.float32)                     # (nh*bt, S, dt)

    # ---- output projection folded per head (no concat), reduce over heads ----
    ctx = ctx.reshape(n_head, rows, dt)
    attn = jnp.einsum('hrd,hde->hre', ctx, w_out_ref[...],
                      preferred_element_type=jnp.float32)                    # (nh, rows, D)
    attn = jnp.sum(attn, axis=0) + vec_ref[0:1, :]                           # + bc -> (rows, D)

    # ---- residual + LN1, FFN, residual + LN2 on collapsed rows ----
    y = attn + x2
    mu = jnp.mean(y, axis=-1, keepdims=True)
    var = jnp.mean((y - mu) ** 2, axis=-1, keepdims=True)
    y = (y - mu) * lax.rsqrt(var + eps)
    y = vec_ref[1:2, :] * y + vec_ref[2:3, :]                                # gamma1, beta1
    # dropout1: identity (eval)

    h1 = jnp.dot(y, w1_ref[...], preferred_element_type=jnp.float32) + b1_ref[...]
    h1 = jnp.maximum(h1, 0.0)
    # ffn-internal dropout: identity (eval)
    f = jnp.dot(h1, w2_ref[...], preferred_element_type=jnp.float32) + vec_ref[3:4, :]  # + b2

    z = f + y
    mu2 = jnp.mean(z, axis=-1, keepdims=True)
    var2 = jnp.mean((z - mu2) ** 2, axis=-1, keepdims=True)
    z = (z - mu2) * lax.rsqrt(var2 + eps)
    z = vec_ref[4:5, :] * z + vec_ref[5:6, :]                                # gamma2, beta2
    # dropout2: identity (eval)

    o_ref[...] = z.reshape(bt, S, D).astype(o_ref.dtype)


def pack_params(params, *, n_head):
    """Pack the 16 raw parameter arrays into 7 kernel inputs (wrapper-side, cheap)."""
    (wq, bq, wk, bk, wv, bv, wc, bc, g1, be1, w1, b1, w2, b2, g2, be2) = params
    D = wq.shape[0]
    dt = D // n_head
    scale = 1.0 / jnp.sqrt(jnp.float32(dt))   # folded into Q weight/bias (free, wrapper-side)

    def w_heads(w):      # (D, D) -> (n_head, D, dt); head h = output cols [h*dt,(h+1)*dt)
        return w.reshape(D, n_head, dt).transpose(1, 0, 2)

    def b_heads(b):      # (1, D) -> (n_head, 1, dt)
        return b.reshape(n_head, dt)[:, None, :]

    w_qkv = jnp.concatenate([w_heads(wq) * scale, w_heads(wk), w_heads(wv)], axis=-1)  # (nh, D, 3dt)
    b_qkv = jnp.concatenate([b_heads(bq) * scale, b_heads(bk), b_heads(bv)], axis=-1)  # (nh, 1, 3dt)
    w_out = wc.reshape(n_head, dt, D)                                                  # (nh, dt, D)
    vec_d = jnp.concatenate([bc, g1, be1, b2, g2, be2], axis=0)                        # (6, D)
    return (w_qkv, b_qkv, w_out, vec_d, w1, b1, w2)


def _pick_batch_tile(B):
    # Keep >= 2 grid steps when possible (v7x has 2 TensorCores/chip) while using
    # the largest batch tile that divides B (amortizes ~0.35 us per-step overhead).
    if B < 2:
        return 1
    return max(d for d in range(1, B + 1) if B % d == 0 and B // d >= 2)


def encoder_layer(x, mask, params, *, n_head, batch_tile=None):
    B, S, D = x.shape
    if batch_tile is None:
        batch_tile = _pick_batch_tile(B)
    assert B % batch_tile == 0
    packed = pack_params(params, n_head=n_head)

    def full_spec(p):
        nd = p.ndim
        return pl.BlockSpec(p.shape, lambda b, _nd=nd: (0,) * _nd)

    in_specs = [pl.BlockSpec((batch_tile, S, D), lambda b: (b, 0, 0)),
                pl.BlockSpec((batch_tile, 1, S), lambda b: (b, 0, 0))]
    in_specs += [full_spec(p) for p in packed]

    return pl.pallas_call(
        functools.partial(encoder_layer_kernel, n_head=n_head),
        out_shape=jax.ShapeDtypeStruct((B, S, D), x.dtype),
        grid_spec=pltpu.PrefetchScalarGridSpec(
            num_scalar_prefetch=0,
            grid=(B // batch_tile,),
            in_specs=in_specs,
            out_specs=pl.BlockSpec((batch_tile, S, D), lambda b: (b, 0, 0)),
        ),
        compiler_params=pltpu.CompilerParams(
            dimension_semantics=("parallel",)),
    )(x, mask, *packed)


def encoder_layer_ref(x, mask, params, *, n_head):
    """Pure-JAX reference (mirrors the PyTorch module, eval mode)."""
    (wq, bq, wk, bk, wv, bv, wc, bc, g1, be1, w1, b1, w2, b2, g2, be2) = params
    B, S, D = x.shape
    dt = D // n_head

    def ln(y, g, b):
        mu = jnp.mean(y, axis=-1, keepdims=True)
        var = jnp.mean((y - mu) ** 2, axis=-1, keepdims=True)
        return g * ((y - mu) / jnp.sqrt(var + 1e-12)) + b

    q = x @ wq + bq
    k = x @ wk + bk
    v = x @ wv + bv
    qh = q.reshape(B, S, n_head, dt).transpose(0, 2, 1, 3)
    kh = k.reshape(B, S, n_head, dt).transpose(0, 2, 1, 3)
    vh = v.reshape(B, S, n_head, dt).transpose(0, 2, 1, 3)
    score = jnp.einsum("bhqd,bhkd->bhqk", qh, kh) / jnp.sqrt(jnp.float32(dt))
    score = jnp.where(mask[:, None, :, :] == 0.0, -10000.0, score)
    p = jax.nn.softmax(score, axis=-1)
    o = jnp.einsum("bhqk,bhkd->bhqd", p, vh).transpose(0, 2, 1, 3).reshape(B, S, D)
    attn = o @ wc + bc
    y = ln(attn + x, g1, be1)
    f = jnp.maximum(y @ w1 + b1, 0.0) @ w2 + b2
    return ln(f + y, g2, be2)


if __name__ == "__main__":
    B, S, D = 2, 8, 32
    n_head, H = 4, 64

    key = jax.random.PRNGKey(0)
    ks = jax.random.split(key, 10)

    def init_w(k, shape, fan_in):
        lim = 1.0 / jnp.sqrt(jnp.float32(fan_in))
        return jax.random.uniform(k, shape, jnp.float32, -lim, lim)

    # Weights stored pre-transposed: (in, out), so the math is x @ W + b.
    wq = init_w(ks[0], (D, D), D); bq = jnp.zeros((1, D), jnp.float32)
    wk = init_w(ks[1], (D, D), D); bk = jnp.zeros((1, D), jnp.float32)
    wv = init_w(ks[2], (D, D), D); bv = jnp.zeros((1, D), jnp.float32)
    wc = init_w(ks[3], (D, D), D); bc = jnp.zeros((1, D), jnp.float32)
    g1 = jnp.ones((1, D), jnp.float32); be1 = jnp.zeros((1, D), jnp.float32)
    w1 = init_w(ks[4], (D, H), D); b1 = 0.01 * jnp.ones((1, H), jnp.float32)
    w2 = init_w(ks[5], (H, D), H); b2 = 0.01 * jnp.ones((1, D), jnp.float32)
    g2 = jnp.ones((1, D), jnp.float32); be2 = jnp.zeros((1, D), jnp.float32)
    params = (wq, bq, wk, bk, wv, bv, wc, bc, g1, be1, w1, b1, w2, b2, g2, be2)

    x = jax.random.normal(ks[6], (B, S, D), jnp.float32)
    # src_mask: batch 0 fully valid, batch 1 has the last 2 key positions masked.
    mask = jnp.ones((B, 1, S), jnp.float32)
    mask = mask.at[1, 0, S - 2:].set(0.0)

    out = encoder_layer(x, mask, params, n_head=n_head)
    out = jax.block_until_ready(out)

    ref = encoder_layer_ref(x, mask, params, n_head=n_head)
    assert out.shape == (B, S, D) and out.dtype == jnp.float32
    # Tolerance slightly looser than 1e-4: kernel uses EUP approx reciprocal for
    # the softmax denominator and rsqrt for LayerNorm.
    assert jnp.allclose(out, ref, atol=1e-3, rtol=1e-3), "Pallas kernel mismatch vs reference"

    print("KERNEL_OK")
</pallas_src>

<mosaic_0001>
module attributes {stable_mosaic.version = 11 : i64} {
  func.func @encoder_layer_kernel(%arg0: i32, %arg1: memref<1x8x32xf32, #tpu.memory_space<vmem>>, %arg2: memref<1x1x8xf32, #tpu.memory_space<vmem>>, %arg3: memref<4x32x24xf32, #tpu.memory_space<vmem>>, %arg4: memref<4x1x24xf32, #tpu.memory_space<vmem>>, %arg5: memref<4x8x32xf32, #tpu.memory_space<vmem>>, %arg6: memref<6x32xf32, #tpu.memory_space<vmem>>, %arg7: memref<32x64xf32, #tpu.memory_space<vmem>>, %arg8: memref<1x64xf32, #tpu.memory_space<vmem>>, %arg9: memref<64x32xf32, #tpu.memory_space<vmem>>, %arg10: memref<1x8x32xf32, #tpu.memory_space<vmem>>) attributes {dimension_semantics = [#tpu.dimension_semantics<parallel>], iteration_bounds = array<i64: 2>, scalar_prefetch = 0 : i64, scratch_operands = 0 : i64, tpu.core_type = #tpu.core_type<tc>, window_params = [{transform_indices = @transform_0, window_bounds = array<i64: 1, 8, 32>}, {transform_indices = @transform_1, window_bounds = array<i64: 1, 1, 8>}, {pipeline_mode = #tpu.pipeline_mode<synchronous>, transform_indices = @transform_2, window_bounds = array<i64: 4, 32, 24>}, {pipeline_mode = #tpu.pipeline_mode<synchronous>, transform_indices = @transform_3, window_bounds = array<i64: 4, 1, 24>}, {pipeline_mode = #tpu.pipeline_mode<synchronous>, transform_indices = @transform_4, window_bounds = array<i64: 4, 8, 32>}, {pipeline_mode = #tpu.pipeline_mode<synchronous>, transform_indices = @transform_5, window_bounds = array<i64: 6, 32>}, {pipeline_mode = #tpu.pipeline_mode<synchronous>, transform_indices = @transform_6, window_bounds = array<i64: 32, 64>}, {pipeline_mode = #tpu.pipeline_mode<synchronous>, transform_indices = @transform_7, window_bounds = array<i64: 1, 64>}, {pipeline_mode = #tpu.pipeline_mode<synchronous>, transform_indices = @transform_8, window_bounds = array<i64: 64, 32>}, {transform_indices = @transform_9, window_bounds = array<i64: 1, 8, 32>}]} {
    %c0 = arith.constant 0 : index
    %c0_0 = arith.constant 0 : index
    %c0_1 = arith.constant 0 : index
    %0 = vector.load %arg1[%c0, %c0_0, %c0_1] : memref<1x8x32xf32, #tpu.memory_space<vmem>>, vector<1x8x32xf32>
    %1 = vector.shape_cast %0 : vector<1x8x32xf32> to vector<8x32xf32>
    %2 = vector.shape_cast %1 : vector<8x32xf32> to vector<1x8x32xf32>
    %3 = vector.shape_cast %2 : vector<1x8x32xf32> to vector<1x8x32xf32>
    %4 = vector.broadcast %3 : vector<1x8x32xf32> to vector<4x8x32xf32>
    %c0_2 = arith.constant 0 : index
    %c0_3 = arith.constant 0 : index
    %c0_4 = arith.constant 0 : index
    %5 = vector.load %arg3[%c0_2, %c0_3, %c0_4] : memref<4x32x24xf32, #tpu.memory_space<vmem>>, vector<4x32x24xf32>
    "tpu.trace_start"() <{level = 10 : i32, message = "hrd,hde->hre"}> : () -> ()
    %cst = arith.constant dense<0.000000e+00> : vector<4x8x24xf32>
    %6 = tpu.matmul %4, %5, %cst {dimension_numbers = #tpu.dot_dimension_numbers<[2], [1], [1], [2], [0, 0, 0, 1, 1, 2], [0], [0]>} : vector<4x8x32xf32>, vector<4x32x24xf32>, vector<4x8x24xf32> -> vector<4x8x24xf32>
    "tpu.trace_stop"() : () -> ()
    %c0_5 = arith.constant 0 : index
    %c0_6 = arith.constant 0 : index
    %c0_7 = arith.constant 0 : index
    %7 = vector.load %arg4[%c0_5, %c0_6, %c0_7] : memref<4x1x24xf32, #tpu.memory_space<vmem>>, vector<4x1x24xf32>
    %8 = vector.broadcast %7 : vector<4x1x24xf32> to vector<4x8x24xf32>
    %9 = arith.addf %6, %8 : vector<4x8x24xf32>
    %10 = vector.extract_strided_slice %9 {offsets = [0, 0, 0], sizes = [4, 8, 8], strides = [1, 1, 1]} : vector<4x8x24xf32> to vector<4x8x8xf32>
    %11 = vector.extract_strided_slice %9 {offsets = [0, 0, 8], sizes = [4, 8, 8], strides = [1, 1, 1]} : vector<4x8x24xf32> to vector<4x8x8xf32>
    %12 = vector.extract_strided_slice %9 {offsets = [0, 0, 16], sizes = [4, 8, 8], strides = [1, 1, 1]} : vector<4x8x24xf32> to vector<4x8x8xf32>
    %c0_8 = arith.constant 0 : index
    %c0_9 = arith.constant 0 : index
    %c0_10 = arith.constant 0 : index
    %13 = vector.load %arg2[%c0_8, %c0_9, %c0_10] : memref<1x1x8xf32, #tpu.memory_space<vmem>>, vector<1x1x8xf32>
    %14 = vector.shape_cast %13 : vector<1x1x8xf32> to vector<1x1x1x8xf32>
    %15 = vector.shape_cast %14 : vector<1x1x1x8xf32> to vector<1x1x1x8xf32>
    %16 = vector.broadcast %15 : vector<1x1x1x8xf32> to vector<4x1x1x8xf32>
    %17 = vector.shape_cast %16 : vector<4x1x1x8xf32> to vector<4x1x8xf32>
    "tpu.trace_start"() <{level = 10 : i32, message = "bqd,bkd->bqk"}> : () -> ()
    %cst_11 = arith.constant dense<0.000000e+00> : vector<4x8x8xf32>
    %18 = tpu.matmul %10, %11, %cst_11 {dimension_numbers = #tpu.dot_dimension_numbers<[2], [2], [1], [1], [0, 0, 0, 1, 1, 1], [0], [0]>} : vector<4x8x8xf32>, vector<4x8x8xf32>, vector<4x8x8xf32> -> vector<4x8x8xf32>
    %cst_12 = arith.constant 0.000000e+00 : f32
    "tpu.trace_stop"() : () -> ()
    %19 = vector.broadcast %cst_12 : f32 to vector<4x1x8xf32>
    %20 = arith.cmpf oeq, %17, %19 : vector<4x1x8xf32>
    %cst_13 = arith.constant -1.000000e+04 : f32
    %21 = vector.shape_cast %20 : vector<4x1x8xi1> to vector<4x1x8xi1>
    %22 = vector.broadcast %21 : vector<4x1x8xi1> to vector<4x8x8xi1>
    %23 = vector.broadcast %cst_13 : f32 to vector<4x8x8xf32>
    %24 = arith.select %22, %23, %18 : vector<4x8x8xi1>, vector<4x8x8xf32>
    %cst_14 = arith.constant dense<0xFF800000> : vector<4x8xf32>
    %25 = vector.multi_reduction <maximumf>, %24, %cst_14 [2] : vector<4x8x8xf32> to vector<4x8xf32>
    %26 = vector.shape_cast %25 : vector<4x8xf32> to vector<4x8x1xf32>
    %27 = vector.broadcast %26 : vector<4x8x1xf32> to vector<4x8x8xf32>
    %28 = arith.subf %24, %27 : vector<4x8x8xf32>
    %29 = math.exp %28 : vector<4x8x8xf32>
    %cst_15 = arith.constant dense<0.000000e+00> : vector<4x8xf32>
    %30 = vector.multi_reduction <add>, %29, %cst_15 [2] : vector<4x8x8xf32> to vector<4x8xf32>
    %31 = vector.shape_cast %30 : vector<4x8xf32> to vector<4x8x1xf32>
    %32 = tpu.reciprocal %31 {approx = true} : vector<4x8x1xf32> -> vector<4x8x1xf32>
    %33 = vector.broadcast %32 : vector<4x8x1xf32> to vector<4x8x8xf32>
    %34 = arith.mulf %29, %33 : vector<4x8x8xf32>
    "tpu.trace_start"() <{level = 10 : i32, message = "bqk,bkd->bqd"}> : () -> ()
    %cst_16 = arith.constant dense<0.000000e+00> : vector<4x8x8xf32>
    %35 = tpu.matmul %34, %12, %cst_16 {dimension_numbers = #tpu.dot_dimension_numbers<[2], [1], [1], [2], [0, 0, 0, 1, 1, 2], [0], [0]>} : vector<4x8x8xf32>, vector<4x8x8xf32>, vector<4x8x8xf32> -> vector<4x8x8xf32>
    "tpu.trace_stop"() : () -> ()
    %c0_17 = arith.constant 0 : index
    %c0_18 = arith.constant 0 : index
    %c0_19 = arith.constant 0 : index
    %36 = vector.load %arg5[%c0_17, %c0_18, %c0_19] : memref<4x8x32xf32, #tpu.memory_space<vmem>>, vector<4x8x32xf32>
    "tpu.trace_start"() <{level = 10 : i32, message = "hrd,hde->hre"}> : () -> ()
    %cst_20 = arith.constant dense<0.000000e+00> : vector<4x8x32xf32>
    %37 = tpu.matmul %35, %36, %cst_20 {dimension_numbers = #tpu.dot_dimension_numbers<[2], [1], [1], [2], [0, 0, 0, 1, 1, 2], [0], [0]>} : vector<4x8x8xf32>, vector<4x8x32xf32>, vector<4x8x32xf32> -> vector<4x8x32xf32>
    "tpu.trace_stop"() : () -> ()
    %cst_21 = arith.constant dense<0.000000e+00> : vector<8x32xf32>
    %38 = vector.multi_reduction <add>, %37, %cst_21 [0] : vector<4x8x32xf32> to vector<8x32xf32>
    %c0_22 = arith.constant 0 : index
    %c0_23 = arith.constant 0 : index
    %39 = vector.load %arg6[%c0_22, %c0_23] : memref<6x32xf32, #tpu.memory_space<vmem>>, vector<1x32xf32>
    %40 = vector.broadcast %39 : vector<1x32xf32> to vector<8x32xf32>
    %41 = arith.addf %38, %40 : vector<8x32xf32>
    %42 = arith.addf %41, %1 : vector<8x32xf32>
    %cst_24 = arith.constant dense<0.000000e+00> : vector<8xf32>
    %43 = vector.multi_reduction <add>, %42, %cst_24 [1] : vector<8x32xf32> to vector<8xf32>
    %44 = vector.shape_cast %43 : vector<8xf32> to vector<8x1xf32>
    %cst_25 = arith.constant 3.200000e+01 : f32
    %45 = vector.broadcast %cst_25 : f32 to vector<8x1xf32>
    %46 = arith.divf %44, %45 : vector<8x1xf32>
    %47 = vector.broadcast %46 : vector<8x1xf32> to vector<8x32xf32>
    %48 = arith.subf %42, %47 : vector<8x32xf32>
    %49 = arith.mulf %48, %48 : vector<8x32xf32>
    %cst_26 = arith.constant dense<0.000000e+00> : vector<8xf32>
    %50 = vector.multi_reduction <add>, %49, %cst_26 [1] : vector<8x32xf32> to vector<8xf32>
    %51 = vector.shape_cast %50 : vector<8xf32> to vector<8x1xf32>
    %cst_27 = arith.constant 3.200000e+01 : f32
    %52 = vector.broadcast %cst_27 : f32 to vector<8x1xf32>
    %53 = arith.divf %51, %52 : vector<8x1xf32>
    %54 = vector.broadcast %46 : vector<8x1xf32> to vector<8x32xf32>
    %55 = arith.subf %42, %54 : vector<8x32xf32>
    %cst_28 = arith.constant 9.99999996E-13 : f32
    %56 = vector.broadcast %cst_28 : f32 to vector<8x1xf32>
    %57 = arith.addf %53, %56 : vector<8x1xf32>
    %58 = math.rsqrt %57 : vector<8x1xf32>
    %59 = vector.broadcast %58 : vector<8x1xf32> to vector<8x32xf32>
    %60 = arith.mulf %55, %59 : vector<8x32xf32>
    %c1 = arith.constant 1 : index
    %c0_29 = arith.constant 0 : index
    %61 = vector.load %arg6[%c1, %c0_29] : memref<6x32xf32, #tpu.memory_space<vmem>>, vector<1x32xf32>
    %62 = vector.broadcast %61 : vector<1x32xf32> to vector<8x32xf32>
    %63 = arith.mulf %62, %60 : vector<8x32xf32>
    %c2 = arith.constant 2 : index
    %c0_30 = arith.constant 0 : index
    %64 = vector.load %arg6[%c2, %c0_30] : memref<6x32xf32, #tpu.memory_space<vmem>>, vector<1x32xf32>
    %65 = vector.broadcast %64 : vector<1x32xf32> to vector<8x32xf32>
    %66 = arith.addf %63, %65 : vector<8x32xf32>
    %c0_31 = arith.constant 0 : index
    %c0_32 = arith.constant 0 : index
    %67 = vector.load %arg7[%c0_31, %c0_32] : memref<32x64xf32, #tpu.memory_space<vmem>>, vector<32x64xf32>
    %cst_33 = arith.constant dense<0.000000e+00> : vector<8x64xf32>
    %68 = tpu.matmul %66, %67, %cst_33 {dimension_numbers = #tpu.dot_dimension_numbers<[1], [0], [0], [1], [0, 0, 1, 1], [], []>} : vector<8x32xf32>, vector<32x64xf32>, vector<8x64xf32> -> vector<8x64xf32>
    %c0_34 = arith.constant 0 : index
    %c0_35 = arith.constant 0 : index
    %69 = vector.load %arg8[%c0_34, %c0_35] : memref<1x64xf32, #tpu.memory_space<vmem>>, vector<1x64xf32>
    %70 = vector.broadcast %69 : vector<1x64xf32> to vector<8x64xf32>
    %71 = arith.addf %68, %70 : vector<8x64xf32>
    %cst_36 = arith.constant 0.000000e+00 : f32
    %72 = vector.broadcast %cst_36 : f32 to vector<8x64xf32>
    %73 = arith.maximumf %71, %72 : vector<8x64xf32>
    %c0_37 = arith.constant 0 : index
    %c0_38 = arith.constant 0 : index
    %74 = vector.load %arg9[%c0_37, %c0_38] : memref<64x32xf32, #tpu.memory_space<vmem>>, vector<64x32xf32>
    %cst_39 = arith.constant dense<0.000000e+00> : vector<8x32xf32>
    %75 = tpu.matmul %73, %74, %cst_39 {dimension_numbers = #tpu.dot_dimension_numbers<[1], [0], [0], [1], [0, 0, 1, 1], [], []>} : vector<8x64xf32>, vector<64x32xf32>, vector<8x32xf32> -> vector<8x32xf32>
    %c3 = arith.constant 3 : index
    %c0_40 = arith.constant 0 : index
    %76 = vector.load %arg6[%c3, %c0_40] : memref<6x32xf32, #tpu.memory_space<vmem>>, vector<1x32xf32>
    %77 = vector.broadcast %76 : vector<1x32xf32> to vector<8x32xf32>
    %78 = arith.addf %75, %77 : vector<8x32xf32>
    %79 = arith.addf %78, %66 : vector<8x32xf32>
    %cst_41 = arith.constant dense<0.000000e+00> : vector<8xf32>
    %80 = vector.multi_reduction <add>, %79, %cst_41 [1] : vector<8x32xf32> to vector<8xf32>
    %81 = vector.shape_cast %80 : vector<8xf32> to vector<8x1xf32>
    %cst_42 = arith.constant 3.200000e+01 : f32
    %82 = vector.broadcast %cst_42 : f32 to vector<8x1xf32>
    %83 = arith.divf %81, %82 : vector<8x1xf32>
    %84 = vector.broadcast %83 : vector<8x1xf32> to vector<8x32xf32>
    %85 = arith.subf %79, %84 : vector<8x32xf32>
    %86 = arith.mulf %85, %85 : vector<8x32xf32>
    %cst_43 = arith.constant dense<0.000000e+00> : vector<8xf32>
    %87 = vector.multi_reduction <add>, %86, %cst_43 [1] : vector<8x32xf32> to vector<8xf32>
    %88 = vector.shape_cast %87 : vector<8xf32> to vector<8x1xf32>
    %cst_44 = arith.constant 3.200000e+01 : f32
    %89 = vector.broadcast %cst_44 : f32 to vector<8x1xf32>
    %90 = arith.divf %88, %89 : vector<8x1xf32>
    %91 = vector.broadcast %83 : vector<8x1xf32> to vector<8x32xf32>
    %92 = arith.subf %79, %91 : vector<8x32xf32>
    %cst_45 = arith.constant 9.99999996E-13 : f32
    %93 = vector.broadcast %cst_45 : f32 to vector<8x1xf32>
    %94 = arith.addf %90, %93 : vector<8x1xf32>
    %95 = math.rsqrt %94 : vector<8x1xf32>
    %96 = vector.broadcast %95 : vector<8x1xf32> to vector<8x32xf32>
    %97 = arith.mulf %92, %96 : vector<8x32xf32>
    %c4 = arith.constant 4 : index
    %c0_46 = arith.constant 0 : index
    %98 = vector.load %arg6[%c4, %c0_46] : memref<6x32xf32, #tpu.memory_space<vmem>>, vector<1x32xf32>
    %99 = vector.broadcast %98 : vector<1x32xf32> to vector<8x32xf32>
    %100 = arith.mulf %99, %97 : vector<8x32xf32>
    %c5 = arith.constant 5 : index
    %c0_47 = arith.constant 0 : index
    %101 = vector.load %arg6[%c5, %c0_47] : memref<6x32xf32, #tpu.memory_space<vmem>>, vector<1x32xf32>
    %102 = vector.broadcast %101 : vector<1x32xf32> to vector<8x32xf32>
    %103 = arith.addf %100, %102 : vector<8x32xf32>
    %104 = vector.shape_cast %103 : vector<8x32xf32> to vector<1x8x32xf32>
    %c0_48 = arith.constant 0 : index
    %c0_49 = arith.constant 0 : index
    %c0_50 = arith.constant 0 : index
    %105 = vector.load %arg10[%c0_48, %c0_49, %c0_50] : memref<1x8x32xf32, #tpu.memory_space<vmem>>, vector<1x8x32xf32>
    tpu.vector_store %arg10[%c0_48, %c0_49, %c0_50], %104 {strides = array<i32>} : memref<1x8x32xf32, #tpu.memory_space<vmem>>, vector<1x8x32xf32>,
    return
  }
  func.func @transform_0(%arg0: i32) -> (i32, i32, i32) {
    %c0_i32 = arith.constant 0 : i32
    %c0_i32_0 = arith.constant 0 : i32
    %c0_i32_1 = arith.constant 0 : i32
    return %arg0, %c0_i32, %c0_i32_0 : i32, i32, i32
  }
  func.func @transform_1(%arg0: i32) -> (i32, i32, i32) {
    %c0_i32 = arith.constant 0 : i32
    %c0_i32_0 = arith.constant 0 : i32
    %c0_i32_1 = arith.constant 0 : i32
    return %arg0, %c0_i32, %c0_i32_0 : i32, i32, i32
  }
  func.func @transform_2(%arg0: i32) -> (i32, i32, i32) {
    %c0_i32 = arith.constant 0 : i32
    %c0_i32_0 = arith.constant 0 : i32
    %c0_i32_1 = arith.constant 0 : i32
    %c0_i32_2 = arith.constant 0 : i32
    return %c0_i32, %c0_i32_0, %c0_i32_1 : i32, i32, i32
  }
  func.func @transform_3(%arg0: i32) -> (i32, i32, i32) {
    %c0_i32 = arith.constant 0 : i32
    %c0_i32_0 = arith.constant 0 : i32
    %c0_i32_1 = arith.constant 0 : i32
    %c0_i32_2 = arith.constant 0 : i32
    return %c0_i32, %c0_i32_0, %c0_i32_1 : i32, i32, i32
  }
  func.func @transform_4(%arg0: i32) -> (i32, i32, i32) {
    %c0_i32 = arith.constant 0 : i32
    %c0_i32_0 = arith.constant 0 : i32
    %c0_i32_1 = arith.constant 0 : i32
    %c0_i32_2 = arith.constant 0 : i32
    return %c0_i32, %c0_i32_0, %c0_i32_1 : i32, i32, i32
  }
  func.func @transform_5(%arg0: i32) -> (i32, i32) {
    %c0_i32 = arith.constant 0 : i32
    %c0_i32_0 = arith.constant 0 : i32
    %c0_i32_1 = arith.constant 0 : i32
    return %c0_i32, %c0_i32_0 : i32, i32
  }
  func.func @transform_6(%arg0: i32) -> (i32, i32) {
    %c0_i32 = arith.constant 0 : i32
    %c0_i32_0 = arith.constant 0 : i32
    %c0_i32_1 = arith.constant 0 : i32
    return %c0_i32, %c0_i32_0 : i32, i32
  }
  func.func @transform_7(%arg0: i32) -> (i32, i32) {
    %c0_i32 = arith.constant 0 : i32
    %c0_i32_0 = arith.constant 0 : i32
    %c0_i32_1 = arith.constant 0 : i32
    return %c0_i32, %c0_i32_0 : i32, i32
  }
  func.func @transform_8(%arg0: i32) -> (i32, i32) {
    %c0_i32 = arith.constant 0 : i32
    %c0_i32_0 = arith.constant 0 : i32
    %c0_i32_1 = arith.constant 0 : i32
    return %c0_i32, %c0_i32_0 : i32, i32
  }
  func.func @transform_9(%arg0: i32) -> (i32, i32, i32) {
    %c0_i32 = arith.constant 0 : i32
    %c0_i32_0 = arith.constant 0 : i32
    %c0_i32_1 = arith.constant 0 : i32
    return %arg0, %c0_i32, %c0_i32_0 : i32, i32, i32
  }
}

</mosaic_0001>

<bundles_post_ra>
// kernel: tpu_custom_call.1
= control target key start
LH: loop header
LB: loop body
LE: loop exit
PB: predicated region body
PF: predicated region fallthrough
CT: control target
= control target key end

     0   :  { %14 = vsyncpa [#allocation3], 0  ;;  %s2791_s0 = inlined_call_operand.vmem [shape: f32[2,8,32], index: 0, kind: input, shape index: {}]   ;;  %s2792_s1 = inlined_call_operand.vmem [shape: f32[2,1,8], index: 1, kind: input, shape index: {}]   ;;  %s2793_s2 = inlined_call_operand.vmem [shape: f32[4,32,24], index: 2, kind: input, shape index: {}]   ;;  %s2794_s3 = inlined_call_operand.vmem [shape: f32[4,1,24], index: 3, kind: input, shape index: {}]   ;;  %s2795_s4 = inlined_call_operand.vmem [shape: f32[4,8,32], index: 4, kind: input, shape index: {}]   ;;  %s2796_s5 = inlined_call_operand.vmem [shape: f32[6,32], index: 5, kind: input, shape index: {}]   ;;  %s2797_s6 = inlined_call_operand.vmem [shape: f32[32,64], index: 6, kind: input, shape index: {}]   ;;  %s2798_s7 = inlined_call_operand.vmem [shape: f32[1,64], index: 7, kind: input, shape index: {}]   ;;  %s2799_s8 = inlined_call_operand.vmem [shape: f32[64,32], index: 8, kind: input, shape index: {}]   ;;  %s2800_s9 = inlined_call_operand.hbm [shape: f32[2,8,32], index: 9, kind: output, shape index: {}]  }
   0x1   :  { %16 = vsyncpa [#allocation3 + $0x1], 0  ;;  %s2420_s30 = smov 0   ;;  %s2422_s10 = smov 0  }
   0x2   :  { %s2424_s11 = smov 0   ;;  %s2426_s12 = smov 0  }
   0x3 LB: > { %s2441_s13 = sadd.s32 4294967295, %s2361_s12   ;;  %s1957_s14 = sadd.s32 4294967294, %s2361_s12   ;;  %s2361_s12 = sphi %s2426_s12, %s2806_s12   ;;  %s2357_s11 = sphi %s2424_s11, %s2805_s11   ;;  %s2353_s10 = sphi %s2422_s10, %s2804_s10   ;;  %s2349_s30 = sphi %s2420_s30, %s2803_s30  }
   0x4   : > { %s2445_s15 = sadd.s32 1, %s2361_s12   ;;  %s228_s16 = sadd.s32 1, %s2357_s11 }
   0x5   : > { %s225_s17 = ssub.s32 %s2361_s12, %s2445_s15  ;;  %p238_p0 = scmp.ne.s32.totalorder %s2357_s11, %s2353_s10 }
   0x6   : > { %p226_p1 = scmp.eq.s32.totalorder %s225_s17, 0  ;;  %p239_p2 = scmp.eq.s32.totalorder %s2441_s13, 1 }
   0x7   : > { %p244_p3 = scmp.ne.s32.totalorder %s2353_s10, %s2349_s30  ;;  %p245_p4 = scmp.eq.s32.totalorder %s1957_s14, 1 }
   0x8   : > { %s2456_s18 = scalar_select %p226_p1, %s2357_s11, %s228_s16  }
   0x9   : > { %p2458_p5 = por %p239_p2, %p238_p0  ;;  %p2462_p6 = por %p245_p4, %p244_p3 }
   0xa   : > { %p1960_p7 = scmp.ge.s32.totalorder %s2361_s12, 1  ;;  %p297_p8 = scmp.lt.s32.totalorder %s2361_s12, 3 }
   0xc   : > { %p298_p9 = pnand %p1960_p7, %p297_p8 }
   0xd   : > { %v343_v0 = vld [vmem:[%s2793_s2] sm:$0xff] (!%p298_p9)  ;;  %v344_v1 = vld [vmem:[%s2793_s2 + $0x8] sm:$0xff] (!%p298_p9)  ;;  %v2363_v3 = vmov (!%p298_p9), 0.0|0.0   ;;  %v345_v6 = vld [vmem:[%s2793_s2 + $0x10] sm:$0xff] (!%p298_p9)  ;;  %p335_p10 = scmp.lt.s32.totalorder (!%p298_p9), %s2441_s13, 1  ;;  %vm2364_vm0 = vmmov (!%p298_p9), 0   ;;  %v983_v47 = vlaneseq (!%p298_p9) }
   0xe   : > { %301 = sbr.rel (%p298_p9) target bundleno = 2400 (0x960), region = 56  ;;  %v347_v2 = vld [vmem:[%s2793_s2 + $0x20] sm:$0xff] (!%p298_p9)  ;;  %2192 = vmatprep.subr.bf16.mxu0 (!%p298_p9), %v2363_v3  ;;  %v2193_v4 = vpack.c.bf16 (!%p298_p9), %v344_v1, %v343_v0  ;;  %2198 = vmatprep.subr.bf16.mxu1 (!%p298_p9), %v2363_v3  ;;  %v348_v5 = vld [vmem:[%s2793_s2 + $0x28] sm:$0xff] (!%p298_p9)  ;;  %v346_v7 = vld [vmem:[%s2793_s2 + $0x18] sm:$0xff] (!%p298_p9)  ;;  %v2365_v9 = vmov (!%p298_p9), 0.0   ;;  %vm387_vm1 = vcmask (!%p298_p9), 261120  }
   0xf   : > { %v2199_v8 = vpack.c.bf16 (!%p298_p9), %v348_v5, %v347_v2  ;;  %2066 = vmatprep.mubr.msk.f32.mxu0 (!%p298_p9), %vm2364_vm0, %v2365_v9  ;;  %v349_v10 = vld [vmem:[%s2793_s2 + $0x30] sm:$0xff] (!%p298_p9)  ;;  %v350_v11 = vld [vmem:[%s2793_s2 + $0x38] sm:$0xff] (!%p298_p9)  ;;  %2077 = vmatprep.mubr.msk.f32.mxu1 (!%p298_p9), %vm2364_vm0, %v2365_v9  ;;  %v2196_v12 = vpack.c.bf16 (!%p298_p9), %v346_v7, %v345_v6  ;;  %v351_v14 = vld [vmem:[%s2793_s2 + $0x40] sm:$0xff] (!%p298_p9)  ;;  %s2366_s28 = smov (!%p298_p9), 120   ;;  %vm675_vm2 = vcmask (!%p298_p9), 64512   ;;  %v984_v49 = vshrl.u32 (!%p298_p9), %v983_v47, 7 }
  0x10   : > { %2194 = vmatpush3.bf16.msra.mxu0 (!%p298_p9), %v2193_v4  ;;  %v2202_v13 = vpack.c.bf16 (!%p298_p9), %v350_v11, %v349_v10  ;;  %v352_v15 = vld [vmem:[%s2793_s2 + $0x48] sm:$0xff] (!%p298_p9)  ;;  %v355_v16 = vld [vmem:[%s2793_s2 + $0x60] sm:$0xff] (!%p298_p9)  ;;  %v353_v21 = vld [vmem:[%s2793_s2 + $0x50] sm:$0xff] (!%p298_p9)  ;;  %v2367_v51 = vmov (!%p298_p9), 0   ;;  %vm1774_vm5 = vcmask (!%p298_p9), 523264   ;;  %s1997_s24 = sshll.u32 (!%p298_p9), %s2441_s13, 7 }
  0x11   : > { %2195 = vmatprep.subr.bf16.mxu0 (!%p298_p9), %v2363_v3  ;;  %2200 = vmatpush3.bf16.msra.mxu1 (!%p298_p9), %v2199_v8  ;;  %v356_v17 = vld [vmem:[%s2793_s2 + $0x68] sm:$0xff] (!%p298_p9)  ;;  %v2205_v19 = vpack.c.bf16 (!%p298_p9), %v352_v15, %v351_v14  ;;  %v354_v22 = vld [vmem:[%s2793_s2 + $0x58] sm:$0xff] (!%p298_p9)  ;;  %v357_v23 = vld [vmem:[%s2793_s2 + $0x70] sm:$0xff] (!%p298_p9)  ;;  %v985_v50 = vsub.s32 (!%p298_p9), 0, %v984_v49  ;;  %s2748_s16 = scalar_lea.hbm (!%p298_p9), %s2800_s9, %s1997_s24 }
  0x12   : > { %2201 = vmatprep.subr.bf16.mxu1 (!%p298_p9), %v2363_v3  ;;  %v2211_v20 = vpack.c.bf16 (!%p298_p9), %v356_v17, %v355_v16  ;;  %v358_v24 = vld [vmem:[%s2793_s2 + $0x78] sm:$0xff] (!%p298_p9)  ;;  %v2208_v25 = vpack.c.bf16 (!%p298_p9), %v354_v22, %v353_v21  ;;  %v1963_v27 = vld [vmem:[%s2794_s3] ss:$0 sm:$0xff] (!%p298_p9)  ;;  %v1964_v29 = vld [vmem:[%s2794_s3 + $0x1] ss:$0 sm:$0xff] (!%p298_p9) }
  0x13   : > { %v2214_v26 = vpack.c.bf16 (!%p298_p9), %v358_v24, %v357_v23  ;;  %v1965_v35 = vld [vmem:[%s2794_s3 + $0x2] ss:$0 sm:$0xff] (!%p298_p9)  ;;  %v1966_v37 = vld [vmem:[%s2794_s3 + $0x3] ss:$0 sm:$0xff] (!%p298_p9)  ;;  %v1342_v47 = vld [vmem:[%s2795_s4 + $0x10] sm:$0xff] (!%p298_p9) }
  0x14   : > { %2197 = vmatpush3.bf16.msra.mxu0 (!%p298_p9), %v2196_v12 }
  0x15   : > { %s2500_s25 = scalar_select %p335_p10, %s2441_s13, 1  ;;  %2203 = vmatpush3.bf16.msra.mxu1 %v2202_v13  ;;  %2204 = vmatprep.subr.bf16.mxu0 %v2363_v3 }
  0x16   : > { %2210 = vmatprep.subr.bf16.mxu1 %v2363_v3  ;;  %s2369_s13 = smov [#allocation2]  }
  0x17   : > { %s1962_s14 = sshll.u32 %s2500_s25, 3  ;;  %s341_s23 = scalar_lea.vmem %s2792_s1, %s2500_s25 }
  0x18   : > { %s338_s26 = scalar_lea.vmem %s2791_s0, %s1962_s14  ;;  %v671_v48 = vld [vmem:[%s341_s23] sm:$0x1]  ;;  %s2368_s25 = smov 112  }
  0x19   : > { %v2520_v18 = vld [vmem:[%s338_s26] sm:$0xff]  ;;  %vm981_vm3 = vcmp.eq.f32.partialorder %v671_v48, 0.0  ;;  %s332_s14 = sand.u32 1, %s2353_s10  }
  0x1a   : > { %2067 = vmatmul.mubr.msk.f32.vlgmr.msra.gmra.mrb[0].mxu0 %vm387_vm1, %v2520_v18  ;;  %2078 = vmatmul.mubr.msk.f32.vlgmr.msra.gmra.mrb[0].mxu1 %vm387_vm1, %v2520_v18  ;;  %v982_v52 = vsel %vm981_vm3, 1, %v2367_v51  ;;  %s1961_s17 = sshll.u32 %s332_s14, 3  ;;  %s1876_s21 = scalar_lea.sflag [#allocation3], %s332_s14 }
  0x1b   : > { %2206 = vmatpush3.bf16.msra.mxu0 %v2205_v19  ;;  %2212 = vmatpush3.bf16.msra.mxu1 %v2211_v20  ;;  %v986_v53 = vrot.slane %v982_v52, %v985_v50  ;;  %v1343_v50 = vld [vmem:[%s2795_s4 + $0x18] sm:$0xff]  ;;  %s334_s26 = scalar_lea.vmem [#allocation2], %s1961_s17  ;;  %s2303_s17 = sshll.u32 %s2369_s13, 4  ;;  %s2304_s17 = int_to_ptr.vmem [resolvable:$false] %s2303_s17 }
  0x1c   : > { %2207 = vmatprep.subr.bf16.mxu0 %v2363_v3  ;;  %2088 = vmatprep.mubr.msk.f32.mxu0 %vm2364_vm0, %v2365_v9  ;;  %s1889_s27 = sshll.u32 %s334_s26, 4  ;;  %s2305_s23 = scalar_lea.vmem %s2304_s17, 256  ;;  %s2750_s27 = int_to_ptr.vmem [resolvable:$true] %s1889_s27 }
  0x1d   : > { %2213 = vmatprep.subr.bf16.mxu1 %v2363_v3  ;;  %2099 = vmatprep.mubr.msk.f32.mxu1 %vm2364_vm0, %v2365_v9  ;;  %vm987_vm4 = vcmp.eq.s32.totalorder %v986_v53, 1  ;;  %s2299_s22 = scalar_lea.vmem %s2750_s27, 128  ;;  %p2306_p0 = scmp.lt.s32.totalorder %s2750_s27, %s2304_s17 }
  0x1e   : > { %p2300_p11 = scmp.ne.s32.totalorder %s2750_s27, %s2299_s22  ;;  %p2307_p1 = scmp.lt.s32.totalorder %s2305_s23, %s2299_s22 }
  0x1f   : > { %2209 = vmatpush3.bf16.msra.mxu0 %v2208_v25  ;;  %2215 = vmatpush3.bf16.msra.mxu1 %v2214_v26 }
  0x20   : > { %2102 = vmatprep.subr.mxu0 %v2365_v9  ;;  %2117 = vmatprep.subr.mxu1 %v2365_v9  ;;  %p2301_p12 = pnand %p2300_p11, %p2458_p5  ;;  %p2308_p2 = por %p2307_p1, %p2306_p0 }
  0x22   : > { %2089 = vmatmul.mubr.msk.f32.vlgmr.msra.gmra.mrb[2].mxu0 %vm387_vm1, %v2520_v18  ;;  %2100 = vmatmul.mubr.msk.f32.vlgmr.msra.gmra.mrb[2].mxu1 %vm387_vm1, %v2520_v18  ;;  %p2302_p13 = pneg %p2301_p12 }
  0x23   : > { %2104 = vmatprep.mubr.msk.f32.mxu0 %vm2364_vm0, %v2365_v9  ;;  %2119 = vmatprep.mubr.msk.f32.mxu1 %vm2364_vm0, %v2365_v9 }
  0x24   : > { %p2309_p3 = pnand %p2308_p2, %p2302_p13 }
  0xed   : > { %v457_v28 = vpop.f32.mrb[0].mxu0  ;;  %v527_v32 = vpop.f32.mrb[0].mxu1 }
  0xee   : > { %v2562_v30 = vadd.f32 %v1963_v27, %v457_v28  ;;  %v2068_v31 = vpop.f32.mrb[1].mxu0  ;;  %v2079_v33 = vpop.f32.mrb[1].mxu1  ;;  %v2564_v34 = vadd.f32 %v1964_v29, %v527_v32 }
  0xf0   : > { %673 = vrot.lane.b32.xlu0 %v2562_v30, %s2366_s28 }
  0xf4   : > { %751 = vrot.lane.b32.xlu0 %v2564_v34, %s2366_s28 }
  0xf5   : > { %v597_v36 = vpop.f32.mrb[2].mxu0  ;;  %v667_v40 = vpop.f32.mrb[2].mxu1 }
  0xf6   : > { %v2574_v38 = vadd.f32 %v1965_v35, %v597_v36  ;;  %v2090_v39 = vpop.f32.mrb[3].mxu0  ;;  %v2101_v41 = vpop.f32.mrb[3].mxu1  ;;  %v2576_v42 = vadd.f32 %v1966_v37, %v667_v40 }
  0xf8   : > { %828 = vrot.lane.b32.xlu1 %v2574_v38, %s2366_s28 }
  0xfc   : > { %905 = vrot.lane.b32.xlu1 %v2576_v42, %s2366_s28 }
 0x162   : > { %v674_v43 = vpop.permute.xlu0 %673 }
 0x163   : > { %2103 = vmatpush3.xpose.msk.msra.mxu0 %vm675_vm2, %v674_v43 }
 0x164   : > { %2107 = vmatprep.subr.mxu0 %v2365_v9 }
 0x166   : > { %2105 = vmatmul.mubr.msk.f32.vlgmr.msra.gmra.mrb[4].mxu0 %vm675_vm2, %v2562_v30  ;;  %v752_v44 = vpop.permute.xlu0 %751 }
 0x167   : > { %2108 = vmatpush3.xpose.msk.msra.mxu0 %vm675_vm2, %v752_v44  ;;  %2109 = vmatprep.mubr.msk.f32.mxu0 %vm2364_vm0, %v2365_v9 }
 0x168   : > { %2112 = vmatprep.subr.mxu0 %v2365_v9 }
 0x16a   : > { %2110 = vmatmul.mubr.msk.f32.vlgmr.msra.gmra.mrb[6].mxu0 %vm675_vm2, %v2564_v34  ;;  %v829_v45 = vpop.permute.xlu1 %828 }
 0x16b   : > { %2113 = vmatpush3.xpose.msk.msra.mxu0 %vm675_vm2, %v829_v45  ;;  %2114 = vmatprep.mubr.msk.f32.mxu0 %vm2364_vm0, %v2365_v9  ;;  %v1340_v45 = vld [vmem:[%s2795_s4] sm:$0xff] }
 0x16c   : > { %2122 = vmatprep.subr.mxu0 %v2365_v9 }
 0x16e   : > { %2115 = vmatmul.mubr.msk.f32.vlgmr.msra.gmra.mrb[8].mxu0 %vm675_vm2, %v2574_v38  ;;  %v906_v46 = vpop.permute.xlu1 %905 }
 0x16f   : > { %2118 = vmatpush3.xpose.msk.msra.mxu1 %vm675_vm2, %v906_v46  ;;  %2124 = vmatprep.mubr.msk.f32.mxu0 %vm2364_vm0, %v2365_v9  ;;  %v1341_v46 = vld [vmem:[%s2795_s4 + $0x8] sm:$0xff] }
 0x170   : > { %2127 = vmatprep.subr.mxu1 %v2365_v9 }
 0x172   : > { %2120 = vmatmul.mubr.msk.f32.vlgmr.msra.gmra.mrb[4].mxu1 %vm675_vm2, %v2576_v42 }
 0x173   : > { %2129 = vmatprep.mubr.msk.f32.mxu1 %vm2364_vm0, %v2365_v9 }
 0x239   : > { %v746_v54 = vpop.f32.mrb[4].mxu0 }
 0x23a   : > { %v988_v55 = vsel %vm987_vm4, -10000.0, %v746_v54  ;;  %v2106_v56 = vpop.f32.mrb[5].mxu0 }
 0x23b   : > { %v992_v57 = vsel %vm675_vm2, %v988_v55, -inf }
 0x23c   : > { %993 = vmax.xlane.f32.xlu0 %v992_v57 }
 0x23d   : > { %v823_v58 = vpop.f32.mrb[6].mxu0 }
 0x23e   : > { %v989_v59 = vsel %vm987_vm4, -10000.0, %v823_v58  ;;  %v2111_v60 = vpop.f32.mrb[7].mxu0 }
 0x23f   : > { %v995_v61 = vsel %vm675_vm2, %v989_v59, -inf }
 0x240   : > { %996 = vmax.xlane.f32.xlu1 %v995_v61 }
 0x241   : > { %v900_v62 = vpop.f32.mrb[8].mxu0 }
 0x242   : > { %v990_v63 = vsel %vm987_vm4, -10000.0, %v900_v62  ;;  %v2116_v0 = vpop.f32.mrb[9].mxu0 }
 0x243   : > { %v998_v1 = vsel %vm675_vm2, %v990_v63, -inf }
 0x244   : > { %999 = vmax.xlane.f32.xlu0 %v998_v1 }
 0x245   : > { %v977_v2 = vpop.f32.mrb[4].mxu1 }
 0x246   : > { %v991_v4 = vsel %vm987_vm4, -10000.0, %v977_v2  ;;  %v2121_v5 = vpop.f32.mrb[5].mxu1 }
 0x247   : > { %v1001_v6 = vsel %vm675_vm2, %v991_v4, -inf }
 0x248   : > { %1002 = vmax.xlane.f32.xlu0 %v1001_v6 }
 0x251   : > { %1036 = vrot.lane.b32.xlu1 %v2562_v30, %s2368_s25 }
 0x2c9   : > { %v994_v7 = vpop.xlane.xlu0 %993 }
 0x2ca   : > { %v1004_v8 = vsub.f32 %v988_v55, %v994_v7 }
 0x2cc   : > { %v1008_v10 = vmul.f32 1.442695, %v1004_v8 }
 0x2cd   : > { %v997_v11 = vpop.xlane.xlu1 %996 }
 0x2ce   : > { %2279 = vpow2.f32 %v1008_v10  ;;  %v1005_v12 = vsub.f32 %v989_v59, %v997_v11 }
 0x2d0   : > { %v1010_v13 = vmul.f32 1.442695, %v1005_v12 }
 0x2d1   : > { %v1037_v14 = vpop.permute.xlu1 %1036  ;;  %v1000_v15 = vpop.xlane.xlu0 %999 }
 0x2d2   : > { %2281 = vpow2.f32 %v1010_v13  ;;  %v1006_v16 = vsub.f32 %v990_v63, %v1000_v15  ;;  %2123 = vmatpush3.msra.mxu0 %v1037_v14 }
 0x2d3   : > { %2132 = vmatprep.subr.mxu0 %v2365_v9 }
 0x2d4   : > { %v1012_v17 = vmul.f32 1.442695, %v1006_v16 }
 0x2d5   : > { %v1003_v19 = vpop.xlane.xlu0 %1002 }
 0x2d6   : > { %2283 = vpow2.f32 %v1012_v17  ;;  %v1007_v20 = vsub.f32 %v991_v4, %v1003_v19  ;;  %v1676_v19 = vld [vmem:[%s2797_s6] sm:$0xff] }
 0x2d8   : > { %v2280_v21 = vpop.eup %2279  ;;  %v1014_v22 = vmul.f32 1.442695, %v1007_v20  ;;  %v1677_v20 = vld [vmem:[%s2797_s6 + $0x8] sm:$0xff] }
 0x2d9   : > { %v1016_v23 = vsel %vm675_vm2, %v2280_v21, 0.0 }
 0x2da   : > { %2285 = vpow2.f32 %v1014_v22  ;;  %1017 = vadd.xlane.f32.xlu1 %v1016_v23  ;;  %v1679_v22 = vld [vmem:[%s2797_s6 + $0x18] sm:$0xff] }
 0x2dc   : > { %v2282_v24 = vpop.eup %2281 }
 0x2dd   : > { %v1019_v25 = vsel %vm675_vm2, %v2282_v24, 0.0 }
 0x2de   : > { %1020 = vadd.xlane.f32.xlu0 %v1019_v25  ;;  %v1762_v25 = vld [vmem:[%s2799_s8 + $0x8] sm:$0xff] }
 0x2e0   : > { %v2284_v26 = vpop.eup %2283 }
 0x2e1   : > { %v1022_v27 = vsel %vm675_vm2, %v2284_v26, 0.0 }
 0x2e2   : > { %1023 = vadd.xlane.f32.xlu1 %v1022_v27 }
 0x2e4   : > { %v2286_v28 = vpop.eup %2285 }
 0x2e5   : > { %v1025_v29 = vsel %vm675_vm2, %v2286_v28, 0.0 }
 0x2e6   : > { %1026 = vadd.xlane.f32.xlu0 %v1025_v29 }
 0x2f3   : > { %1188 = vrot.lane.b32.xlu1 %v2574_v38, %s2368_s25 }
 0x2f7   : > { %1264 = vrot.lane.b32.xlu1 %v2576_v42, %s2368_s25 }
 0x2fc   : > { %1112 = vrot.lane.b32.xlu0 %v2564_v34, %s2368_s25 }
 0x367   : > { %v1018_v30 = vpop.xlane.xlu1 %1017 }
 0x368   : > { %2287 = vrcp.f32 %v1018_v30  ;;  %v1765_v30 = vld [vmem:[%s2799_s8 + $0x20] sm:$0xff] }
 0x36b   : > { %v1021_v31 = vpop.xlane.xlu0 %1020 }
 0x36c   : > { %2289 = vrcp.f32 %v1021_v31  ;;  %v1766_v31 = vld [vmem:[%s2799_s8 + $0x28] sm:$0xff] }
 0x36f   : > { %v1024_v32 = vpop.xlane.xlu1 %1023 }
 0x370   : > { %2291 = vrcp.f32 %v1024_v32  ;;  %v2229_v32 = vpack.c.bf16 %v1766_v31, %v1765_v30 }
 0x372   : > { %v2288_v33 = vpop.eup %2287 }
 0x373   : > { %v1032_v35 = vmul.f32 %v2288_v33, %v2280_v21  ;;  %v1189_v36 = vpop.permute.xlu1 %1188  ;;  %v1027_v37 = vpop.xlane.xlu0 %1026  ;;  %v2217_v21 = vpack.c.bf16 %v1677_v20, %v1676_v19 }
 0x374   : > { %2293 = vrcp.f32 %v1027_v37 }
 0x375   : > { %2125 = vmatmul.mubr.msk.f32.vlgmr.msra.gmra.mrb[10].mxu0 %vm675_vm2, %v1032_v35 }
 0x376   : > { %v2290_v38 = vpop.eup %2289  ;;  %2133 = vmatpush3.msra.mxu0 %v1189_v36  ;;  %2134 = vmatprep.mubr.msk.f32.mxu0 %vm2364_vm0, %v2365_v9 }
 0x377   : > { %v1033_v39 = vmul.f32 %v2290_v38, %v2282_v24  ;;  %v1113_v34 = vpop.permute.xlu0 %1112  ;;  %2142 = vmatprep.subr.mxu0 %v2365_v9  ;;  %v1265_v40 = vpop.permute.xlu1 %1264  ;;  %v1761_v24 = vld [vmem:[%s2799_s8] sm:$0xff] }
 0x378   : > { %2128 = vmatpush3.msra.mxu1 %v1113_v34  ;;  %v2223_v27 = vpack.c.bf16 %v1762_v25, %v1761_v24  ;;  %v1988_v38 = vld [vmem:[%s2796_s5 + $0x1] ss:$0 sm:$0xff]  ;;  %v1989_v34 = vld [vmem:[%s2796_s5 + $0x2] ss:$0 sm:$0xff] }
 0x379   : > { %2130 = vmatmul.mubr.msk.f32.vlgmr.msra.gmra.mrb[6].mxu1 %vm675_vm2, %v1033_v39  ;;  %2137 = vmatprep.subr.mxu1 %v2365_v9 }
 0x37a   : > { %v2292_v41 = vpop.eup %2291  ;;  %2138 = vmatpush3.msra.mxu1 %v1265_v40  ;;  %2139 = vmatprep.mubr.msk.f32.mxu1 %vm2364_vm0, %v2365_v9 }
 0x37b   : > { %v1034_v42 = vmul.f32 %v2292_v41, %v2284_v26  ;;  %2147 = vmatprep.subr.mxu1 %v2365_v9  ;;  %v1763_v26 = vld [vmem:[%s2799_s8 + $0x10] sm:$0xff] }
 0x37d   : > { %2135 = vmatmul.mubr.msk.f32.vlgmr.msra.gmra.mrb[12].mxu0 %vm675_vm2, %v1034_v42  ;;  %v1768_v42 = vld [vmem:[%s2799_s8 + $0x38] sm:$0xff] }
 0x37e   : > { %v2294_v43 = vpop.eup %2293  ;;  %2144 = vmatprep.mubr.msk.f32.mxu0 %vm2364_vm0, %v2365_v9  ;;  %2143 = vmatpush3.msra.mxu0 %v1340_v45 }
 0x37f   : > { %v1035_v44 = vmul.f32 %v2294_v43, %v2286_v28  ;;  %2152 = vmatprep.subr.mxu0 %v2365_v9  ;;  %v1764_v28 = vld [vmem:[%s2799_s8 + $0x18] sm:$0xff] }
 0x380   : > { %v2226_v29 = vpack.c.bf16 %v1764_v28, %v1763_v26 }
 0x381   : > { %2140 = vmatmul.mubr.msk.f32.vlgmr.msra.gmra.mrb[8].mxu1 %vm675_vm2, %v1035_v44  ;;  %v1990_v44 = vld [vmem:[%s2798_s7] ss:$0 sm:$0xff] }
 0x382   : > { %2149 = vmatprep.mubr.msk.f32.mxu1 %vm2364_vm0, %v2365_v9  ;;  %2148 = vmatpush3.msra.mxu1 %v1341_v46 }
 0x383   : > { %2157 = vmatprep.subr.mxu1 %v2365_v9 }
 0x448   : > { %v1108_v48 = vpop.f32.mrb[10].mxu0 }
 0x449   : > { %v2126_v49 = vpop.f32.mrb[11].mxu0  ;;  %2145 = vmatmul.mubr.msk.f32.vlgmr.msra.gmra.mrb[14].mxu0 %vm675_vm2, %v1108_v48 }
 0x44a   : > { %2153 = vmatpush3.msra.mxu0 %v1342_v47  ;;  %2154 = vmatprep.mubr.msk.f32.mxu0 %vm2364_vm0, %v2365_v9  ;;  %v1992_v49 = vld [vmem:[%s2796_s5 + $0x3] ss:$0 sm:$0xff] }
 0x44b   : > { %2216 = vmatprep.subr.bf16.mxu0 %v2363_v3 }
 0x44c   : > { %v1184_v51 = vpop.f32.mrb[6].mxu1 }
 0x44d   : > { %v2131_v52 = vpop.f32.mrb[7].mxu1  ;;  %2150 = vmatmul.mubr.msk.f32.vlgmr.msra.gmra.mrb[10].mxu1 %vm675_vm2, %v1184_v51 }
 0x44e   : > { %2158 = vmatpush3.msra.mxu1 %v1343_v50  ;;  %2159 = vmatprep.mubr.msk.f32.mxu1 %vm2364_vm0, %v2365_v9 }
 0x44f   : > { %2222 = vmatprep.subr.bf16.mxu1 %v2363_v3 }
 0x450   : > { %v1260_v53 = vpop.f32.mrb[12].mxu0 }
 0x451   : > { %v2136_v54 = vpop.f32.mrb[13].mxu0  ;;  %2155 = vmatmul.mubr.msk.f32.vlgmr.msra.gmra.mrb[16].mxu0 %vm675_vm2, %v1260_v53 }
 0x452   : > { %2170 = vmatprep.mubr.msk.f32.mxu0 %vm2364_vm0, %v2365_v9  ;;  %2218 = vmatpush3.bf16.msra.mxu0 %v2217_v21 }
 0x453   : > { %2219 = vmatprep.subr.bf16.mxu0 %v2363_v3 }
 0x454   : > { %v1336_v55 = vpop.f32.mrb[8].mxu1 }
 0x455   : > { %v2141_v56 = vpop.f32.mrb[9].mxu1  ;;  %2160 = vmatmul.mubr.msk.f32.vlgmr.msra.gmra.mrb[12].mxu1 %vm675_vm2, %v1336_v55 }
 0x456   : > { %2189 = vmatprep.mubr.msk.f32.mxu1 %vm2364_vm0, %v2365_v9  ;;  %v1987_v9 = vld [vmem:[%s2796_s5] ss:$0 sm:$0xff]  ;;  %2224 = vmatpush3.bf16.msra.mxu1 %v2223_v27 }
 0x457   : > { %2225 = vmatprep.subr.bf16.mxu1 %v2363_v3 }
 0x45a   : > { %2227 = vmatpush3.bf16.msra.mxu1 %v2226_v29 }
 0x45b   : > { %2228 = vmatprep.subr.bf16.mxu1 %v2363_v3 }
 0x45e   : > { %2230 = vmatpush3.bf16.msra.mxu1 %v2229_v32 }
 0x45f   : > { %2231 = vmatprep.subr.bf16.mxu1 %v2363_v3  ;;  %v1767_v3 = vld [vmem:[%s2799_s8 + $0x30] sm:$0xff] }
 0x460   : > { %v2232_v43 = vpack.c.bf16 %v1768_v42, %v1767_v3 }
 0x462   : > { %2233 = vmatpush3.bf16.msra.mxu1 %v2232_v43 }
 0x51c   : > { %v1413_v57 = vpop.f32.mrb[14].mxu0 }
 0x51d   : > { %v2146_v58 = vpop.f32.mrb[15].mxu0  ;;  %v1636_v60 = vsel %vm387_vm1, %v1413_v57, 0.0 }
 0x520   : > { %v1486_v59 = vpop.f32.mrb[10].mxu1 }
 0x521   : > { %v1637_v61 = vsel %vm387_vm1, %v1486_v59, 0.0  ;;  %v2151_v62 = vpop.f32.mrb[11].mxu1 }
 0x522   : > { %v1638_v63 = vadd.f32 %v1637_v61, %v1636_v60 }
 0x524   : > { %v1559_v0 = vpop.f32.mrb[16].mxu0 }
 0x525   : > { %v1639_v1 = vsel %vm387_vm1, %v1559_v0, 0.0  ;;  %v2156_v2 = vpop.f32.mrb[17].mxu0  ;;  %v1994_v0 = vld [vmem:[%s2796_s5 + $0x4] ss:$0 sm:$0xff] }
 0x526   : > { %v1640_v4 = vadd.f32 %v1639_v1, %v1638_v63  ;;  %v1995_v2 = vld [vmem:[%s2796_s5 + $0x5] ss:$0 sm:$0xff] }
 0x528   : > { %v1632_v5 = vpop.f32.mrb[12].mxu1 }
 0x529   : > { %v1641_v6 = vsel %vm387_vm1, %v1632_v5, 0.0  ;;  %v2161_v7 = vpop.f32.mrb[13].mxu1 }
 0x52a   : > { %v1642_v8 = vadd.f32 %v1641_v6, %v1640_v4 }
 0x52c   : > { %v1648_v10 = vadd.f32 %v1987_v9, %v1642_v8 }
 0x52e   : > { %v1649_v11 = vadd.f32 %v1648_v10, %v2520_v18  ;;  %v1678_v18 = vld [vmem:[%s2797_s6 + $0x10] sm:$0xff] }
 0x52f   : > { %v2220_v23 = vpack.c.bf16 %v1679_v22, %v1678_v18 }
 0x530   : > { %v1650_v12 = vsel %vm387_vm1, %v1649_v11, 0.0 }
 0x531   : > { %1651 = vadd.xlane.f32.xlu0 %v1650_v12  ;;  %2221 = vmatpush3.bf16.msra.mxu0 %v2220_v23 }
 0x5be   : > { %v1652_v13 = vpop.xlane.xlu0 %1651 }
 0x5bf   : > { %v1654_v14 = vmul.f32 0.03125, %v1652_v13 }
 0x5c1   : > { %v1655_v15 = vsub.f32 %v1649_v11, %v1654_v14 }
 0x5c3   : > { %v1656_v16 = vmul.f32 %v1655_v15, %v1655_v15 }
 0x5c5   : > { %v1657_v17 = vsel %vm387_vm1, %v1656_v16, 0.0 }
 0x5c6   : > { %1658 = vadd.xlane.f32.xlu1 %v1657_v17 }
 0x653   : > { %v1659_v33 = vpop.xlane.xlu1 %1658 }
 0x654   : > { %v1660_v35 = vmul.f32 0.03125, %v1659_v33 }
 0x656   : > { %v1661_v36 = vadd.f32 1e-12, %v1660_v35 }
 0x658   : > { %2295 = vrsqrt.f32 %v1661_v36 }
 0x662   : > { %v2296_v37 = vpop.eup %2295 }
 0x663   : > { %v1663_v39 = vmul.f32 %v2296_v37, %v1655_v15 }
 0x665   : > { %v1669_v40 = vmul.f32 %v1988_v38, %v1663_v39 }
 0x667   : > { %v1675_v41 = vadd.f32 %v1989_v34, %v1669_v40 }
 0x669   : > { %2171 = vmatmul.mubr.msk.f32.vlgmr.msra.gmra.mrb[18].mxu0 %vm387_vm1, %v1675_v41 }
 0x73c   : > { %v1756_v45 = vpop.f32.mrb[18].mxu0 }
 0x73d   : > { %v1757_v46 = vadd.f32 %v1990_v44, %v1756_v45  ;;  %v2172_v47 = vpop.f32.mrb[19].mxu0 }
 0x73f   : > { %v1760_v48 = vmax.f32 %v1757_v46, 0.0 }
 0x741   : > { %2190 = vmatmul.mubr.msk.f32.vlgmr.msra.gmra.mrb[14].mxu1 %vm1774_vm5, %v1760_v48 }
 0x814   : > { %v1844_v50 = vpop.f32.mrb[14].mxu1 }
 0x815   : > { %v1845_v51 = vadd.f32 %v1992_v49, %v1844_v50  ;;  %v2191_v52 = vpop.f32.mrb[15].mxu1 }
 0x817   : > { %v1848_v53 = vadd.f32 %v1845_v51, %v1675_v41 }
 0x819   : > { %v1849_v54 = vsel %vm387_vm1, %v1848_v53, 0.0 }
 0x81a   : > { %1850 = vadd.xlane.f32.xlu0 %v1849_v54 }
 0x8a7   : > { %v1851_v55 = vpop.xlane.xlu0 %1850 }
 0x8a8   : > { %v1852_v56 = vmul.f32 0.03125, %v1851_v55 }
 0x8aa   : > { %v1853_v57 = vsub.f32 %v1848_v53, %v1852_v56 }
 0x8ac   : > { %v1854_v58 = vmul.f32 %v1853_v57, %v1853_v57 }
 0x8ae   : > { %v1855_v59 = vsel %vm387_vm1, %v1854_v58, 0.0 }
 0x8af   : > { %1856 = vadd.xlane.f32.xlu0 %v1855_v59 }
 0x93c   : > { %v1857_v60 = vpop.xlane.xlu0 %1856 }
 0x93d   : > { %v1858_v61 = vmul.f32 0.03125, %v1857_v60 }
 0x93f   : > { %v1859_v62 = vadd.f32 1e-12, %v1858_v61 }
 0x941   : > { %2297 = vrsqrt.f32 %v1859_v62 }
 0x94b   : > { %v2298_v63 = vpop.eup %2297 }
 0x94c   : > { %v1861_v1 = vmul.f32 %v2298_v63, %v1853_v57 }
 0x94e   : > { %v1867_v4 = vmul.f32 %v1994_v0, %v1861_v1 }
 0x950   : > { %v1873_v5 = vadd.f32 %v1995_v2, %v1867_v4 }
 0x952   : > { %1874 = vst.msk [vmem:[%s334_s26] sm:$0xff] %vm387_vm1, %v1873_v5 }
 0x953   : > { %2312 = shalt.err (!%p2309_p3)
}
 0x954   : > { %s2313_s14 = scalar_lea.hbm %s2748_s16, 128  ;;  %s2317_s26 = scalar_lea.hbm %s2800_s9, 256 }
 0x955   : > { %p2314_p4 = scmp.ne.s32.totalorder %s2748_s16, %s2313_s14  ;;  %p2318_p9 = scmp.lt.u32.totalorder %s2748_s16, %s2800_s9 }
 0x956   : > { %p2319_p10 = scmp.lt.u32.totalorder %s2317_s26, %s2313_s14  ;;  %p2321_p12 = scmp.lt.u32.totalorder %s2313_s14, %s2748_s16 }
 0x957   : > { %p2315_p7 = pnand %p2314_p4, %p2458_p5 }
 0x958   : > { %p2320_p11 = por %p2319_p10, %p2318_p9 }
 0x959   : > { %p2316_p8 = pneg %p2315_p7 }
 0x95a   : > { %p2322_p13 = por %p2321_p12, %p2320_p11 }
 0x95c   : > { %p2323_p0 = pnand %p2322_p13, %p2316_p8 }
 0x95e   : > { %2326 = shalt.err (!%p2323_p0)
}
 0x95f   : > { %2234 = dma.vmem_to_hbm [thread:$0]  (%p2458_p5), %s2750_s27, 128, %s2748_s16, %s1876_s21  }
 0x960 PF: > { %p2240_p1 = scmp.ge.s32.totalorder %s2361_s12, 2  ;;  %s1901_s22 = sand.u32 1, %s2349_s30  }
 0x961   : > { %s1902_s13 = scalar_lea.sflag [#allocation3], %s1901_s22 }
 0x962   : > { %p2237_p2 = pnand %p2240_p1, %p2462_p6 }
 0x964   : > { %2344 = dma.done.wait (!%p2237_p2), %s1902_s13, 128  }
 0x965   : > { %2346 = vsyncadd (!%p2237_p2), %s1902_s13, 4294967168  ;;  %p19_p3 = scmp.ge.s32.totalorder %s2445_s15, 4   ;;  %s2803_s30 = smov %s2353_s10 }
 0x966   : > { %s2804_s10 = smov %s2357_s11  ;;  %s2805_s11 = smov %s2456_s18 }
 0x967   : > { %s2806_s12 = smov %s2445_s15  ;;  %21 = sbr.rel (!%p19_p3) target bundleno = 3 (0x3), region = 94 }
 0x96e   :  { %1907 = vsyncpa [#allocation3], 1 }
 0x96f   :  { %1909 = vsyncpa [#allocation3 + $0x1], 1 }

</bundles_post_ra>
